<compile_context>
chip_gen: v7x
topology: tpu7x:2x2x1
jax: 0.10.0
libtpu: 0.0.40
codegen_flags: <defaults>
</compile_context>

<pallas_src>
import jax
import jax.numpy as jnp
from jax.experimental import pallas as pl
from jax.experimental.pallas import tpu as pltpu

# ---- model hyper-parameters (EmbeddingNet.__init__ args) -------------------
INPUT_SIZE = 4       # conv1 in_channels (C)
HIDDEN_SIZE = 8      # conv1/conv2 out_channels, nn.Linear in_features (H)
SEQ_LEN = 9          # L; conv1 (kernel=2, valid) -> L-1 = 8 == HIDDEN_SIZE
OUTPUT_SIZE = 16     # nn.Linear out_features (O)
BATCH = 2            # per-branch batch (anchor / positive / negative)

_L1 = SEQ_LEN - 1                 # conv1 output length (8)
_KIN = INPUT_SIZE * SEQ_LEN       # flattened input features (36)
_ONES_COL = _KIN                  # homogeneous-coordinate ("ones") column (36)
_KPAD = 128                       # padded lane width of every matmul operand
_HL = HIDDEN_SIZE * _L1           # flattened hidden width (64)
_HO = HIDDEN_SIZE * OUTPUT_SIZE   # flattened output width (128)
_ROWS = 8                         # sublane-padded stacked batch (3*BATCH -> 8)


# ---------------------------------------------------------------------------
# Pallas kernel: whole-triplet EmbeddingNet forward in one invocation
# ---------------------------------------------------------------------------
def _triplet_kernel(a_ref, p_ref, n_ref, w_ref, o_ref, xs_ref):
    """3 single-pass bf16 MXU matmuls + 2 f32 VPU ReLUs; no in-kernel
    transposes / reshapes; all matmul tiles are full (8,128)/(128,128).

    a/p/n_ref : (B, C*L) f32        flattened anchor / positive / negative
    w_ref     : (3, 128, 128) bf16  packed+padded [conv1 | conv2 | fc] planes
                                    (biases folded in via the ones column)
    o_ref     : (8, 128) f32        lane-dense stacked output (rows 6:8 = pad)
    xs_ref    : (8, 128) f32        scratch: stacked, padded LHS
    """
    nb, k = a_ref.shape
    # Assemble the (8,128) LHS: rows 0:2/2:4/4:6 <- a/p/n, column 36 <- 1.0
    # (activates the folded bias rows), everything else <- 0 (must be zeroed:
    # stale VMEM could hold NaN patterns that would poison the matmuls).
    xs_ref[...] = jnp.zeros_like(xs_ref)
    xs_ref[0 * nb:1 * nb, 0:k] = a_ref[...]
    xs_ref[1 * nb:2 * nb, 0:k] = p_ref[...]
    xs_ref[2 * nb:3 * nb, 0:k] = n_ref[...]
    xs_ref[:, k:k + 1] = jnp.ones((xs_ref.shape[0], 1), xs_ref.dtype)

    x = xs_ref[...].astype(w_ref.dtype)                 # bf16 MXU operand
    h = jnp.dot(x, w_ref[0], preferred_element_type=jnp.float32)
    h = jnp.maximum(h, 0.0)                             # ReLU(conv1), f32
    h = jnp.dot(h.astype(w_ref.dtype), w_ref[1],
                preferred_element_type=jnp.float32)
    h = jnp.maximum(h, 0.0)                             # ReLU(conv2), f32
    # Dropout(p=0.2): identity in inference/eval mode.
    # TODO(synk): training-mode dropout (pltpu.prng_* mask) not implemented.
    out = jnp.dot(h.astype(w_ref.dtype), w_ref[2],
                  preferred_element_type=jnp.float32)
    o_ref[...] = out.astype(o_ref.dtype)


# ---------------------------------------------------------------------------
# One-time parameter layout plumbing (outside the kernel)
# ---------------------------------------------------------------------------
def prepare_params(raw_params, mxu_dtype=jnp.bfloat16):
    """Fold the PyTorch-shaped conv/linear params into a single (3, 128, 128)
    packed weight tensor.  Done once at parameter-load time, not per forward.

      plane 0: conv1 (k=2, valid), tap gather folded in via shift matrices so
               it acts directly on x.reshape(B, C*L); bias in row 36.
      plane 1: conv2 (k=1 channel mix) expanded over positions; bias row 127.
      plane 2: fc over the length axis (block-diagonal per hidden row);
               bias row 127.
    Biases ride on a homogeneous "ones" column: x[:, 36] == 1 is propagated to
    column 127 of every intermediate, so no separate bias operands are needed.
    """
    w1, b1, w2, b2, wf, bf = raw_params
    H, C, K = w1.shape                      # Conv1d(C, H, 2).weight
    O, Hf = wf.shape                        # Linear(H, O).weight
    L, L1 = SEQ_LEN, _L1
    assert K == 2 and Hf == L1 == HIDDEN_SIZE, \
        "EmbeddingNet requires L-1 == hidden_size (inherited from PyTorch fc)"
    assert _HO == _KPAD and _ONES_COL < _KPAD - 1 and _HL <= _KPAD - 1

    f32 = jnp.float32
    # conv1: input position p contributes to output position l iff p == l
    # (tap 0) or p == l + 1 (tap 1) -> fold the gather with shift matrices.
    S0 = jnp.eye(L, L1, k=0, dtype=f32)           # (L, L1): p == l
    S1 = jnp.eye(L, L1, k=-1, dtype=f32)          # (L, L1): p == l + 1
    W1 = jnp.kron(w1[:, :, 0].T, S0) + jnp.kron(w1[:, :, 1].T, S1)  # (C*L, H*L1)
    B1 = jnp.repeat(b1, L1)                                         # (H*L1,)
    # conv2: pointwise channel mix, positions kept independent.
    W2 = jnp.kron(w2[:, :, 0].T, jnp.eye(L1, dtype=f32))            # (H*L1, H*L1)
    B2 = jnp.repeat(b2, L1)
    # fc: acts on the length axis per hidden row -> block diagonal.
    W3 = jnp.kron(jnp.eye(H, dtype=f32), wf.T)                      # (H*L1, H*O)
    B3 = jnp.tile(bf, H)                                            # (H*O,)

    def plane(w, bias, bias_row, carry_one):
        m = jnp.zeros((_KPAD, _KPAD), f32)
        m = m.at[0:w.shape[0], 0:w.shape[1]].set(w)
        m = m.at[bias_row, 0:bias.shape[0]].set(bias)
        if carry_one:                      # propagate the ones to column 127
            m = m.at[bias_row, _KPAD - 1].set(1.0)
        return m

    wpack = jnp.stack([
        plane(W1, B1, _ONES_COL, True),    # ones lives at x column 36
        plane(W2, B2, _KPAD - 1, True),    # ones lives at h column 127
        plane(W3, B3, _KPAD - 1, False),
    ]).astype(mxu_dtype)                   # (3, 128, 128)
    return wpack


# ---------------------------------------------------------------------------
# Wrapper: TripletModel.forward (shared EmbeddingNet on anchor / pos / neg)
# ---------------------------------------------------------------------------
def triplet_forward_fn(anchor, posi, neg, wpack):
    B, C, L = anchor.shape
    assert (C, L) == (INPUT_SIZE, SEQ_LEN) and 3 * B <= _ROWS
    # Row-major collapse (C, L) -> C*L is a free, layout-preserving reshape;
    # the conv1 tap gather is already folded into wpack plane 0, so no
    # concatenates / gathers run per forward call.
    a2 = anchor.reshape(B, C * L)
    p2 = posi.reshape(B, C * L)
    n2 = neg.reshape(B, C * L)

    vmem = pl.BlockSpec(memory_space=pltpu.MemorySpace.VMEM)
    out = pl.pallas_call(
        _triplet_kernel,
        out_shape=jax.ShapeDtypeStruct((_ROWS, _HO), jnp.float32),  # (8, 128)
        in_specs=[vmem] * 4,
        out_specs=vmem,
        scratch_shapes=[pltpu.VMEM((_ROWS, _KPAD), jnp.float32)],
    )(a2, p2, n2, wpack)

    emb = out[:3 * B].reshape(3, B, HIDDEN_SIZE, OUTPUT_SIZE)
    # torch.squeeze removes all size-1 dims (no-op at these shapes).
    return jnp.squeeze(emb[0]), jnp.squeeze(emb[1]), jnp.squeeze(emb[2])


triplet_forward = jax.jit(triplet_forward_fn)


# ---------------------------------------------------------------------------
# deterministic parameters in native PyTorch shapes
# ---------------------------------------------------------------------------
def init_params(key):
    ks = jax.random.split(key, 6)
    C, H, O = INPUT_SIZE, HIDDEN_SIZE, OUTPUT_SIZE
    w1 = jax.random.uniform(ks[0], (H, C, 2), jnp.float32, -0.3, 0.3)  # Conv1d(C,H,2)
    b1 = jax.random.uniform(ks[1], (H,), jnp.float32, -0.1, 0.1)
    w2 = jax.random.uniform(ks[2], (H, H, 1), jnp.float32, -0.3, 0.3)  # Conv1d(H,H,1)
    b2 = jax.random.uniform(ks[3], (H,), jnp.float32, -0.1, 0.1)
    wf = jax.random.uniform(ks[4], (O, H), jnp.float32, -0.3, 0.3)     # Linear(H,O)
    bf = jax.random.uniform(ks[5], (O,), jnp.float32, -0.1, 0.1)
    return (w1, b1, w2, b2, wf, bf)


# plain-JAX f32 reference on the raw PyTorch-shaped params (correctness check)
def _ref_embed(x, raw_params):
    w1, b1, w2, b2, wf, bf = raw_params
    hi = jax.lax.Precision.HIGHEST
    y1 = (jnp.einsum('hc,ncl->nhl', w1[:, :, 0], x[:, :, :-1], precision=hi)
          + jnp.einsum('hc,ncl->nhl', w1[:, :, 1], x[:, :, 1:], precision=hi)
          + b1[None, :, None])
    y1 = jnp.maximum(y1, 0.0)
    y2 = jnp.einsum('gh,nhl->ngl', w2[:, :, 0], y1, precision=hi) + b2[None, :, None]
    y2 = jnp.maximum(y2, 0.0)
    return jnp.einsum('nhl,ol->nho', y2, wf, precision=hi) + bf[None, None, :]


if __name__ == "__main__":
    key = jax.random.PRNGKey(0)
    k_p, k_a, k_pz, k_n = jax.random.split(key, 4)
    raw_params = init_params(k_p)
    wpack = prepare_params(raw_params)          # one-time weight folding

    shape = (BATCH, INPUT_SIZE, SEQ_LEN)
    anchor = jax.random.normal(k_a, shape, jnp.float32)
    posi = jax.random.normal(k_pz, shape, jnp.float32)
    neg = jax.random.normal(k_n, shape, jnp.float32)

    a_emb, p_emb, n_emb = jax.block_until_ready(
        triplet_forward(anchor, posi, neg, wpack))

    # verify against the pure-JAX f32 reference.  The kernel feeds the MXU in
    # bf16 (per review), so the tolerance is loosened from 1e-5 to 5e-2.
    ref = [_ref_embed(t, raw_params) for t in (anchor, posi, neg)]
    for got, want in zip((a_emb, p_emb, n_emb), ref):
        assert got.shape == (BATCH, HIDDEN_SIZE, OUTPUT_SIZE), got.shape
        err = float(jnp.max(jnp.abs(got - want)))
        assert jnp.allclose(got, want, atol=5e-2, rtol=5e-2), err

    print("KERNEL_OK")
</pallas_src>

<mosaic_0001>
module attributes {stable_mosaic.version = 11 : i64} {
  func.func @_triplet_kernel(%arg0: memref<2x36xf32, #tpu.memory_space<vmem>>, %arg1: memref<2x36xf32, #tpu.memory_space<vmem>>, %arg2: memref<2x36xf32, #tpu.memory_space<vmem>>, %arg3: memref<3x128x128xbf16, #tpu.memory_space<vmem>>, %arg4: memref<8x128xf32, #tpu.memory_space<vmem>>, %arg5: memref<8x128xf32, #tpu.memory_space<vmem>>) attributes {dimension_semantics = [], scalar_prefetch = 0 : i64, scratch_operands = 1 : i64, tpu.core_type = #tpu.core_type<tc>} {
    %cst = arith.constant 0.000000e+00 : f32
    %0 = vector.broadcast %cst : f32 to vector<8x128xf32>
    %c0 = arith.constant 0 : index
    %c0_0 = arith.constant 0 : index
    %1 = vector.load %arg5[%c0, %c0_0] : memref<8x128xf32, #tpu.memory_space<vmem>>, vector<8x128xf32>
    tpu.vector_store %arg5[%c0, %c0_0], %0 {strides = array<i32>} : memref<8x128xf32, #tpu.memory_space<vmem>>, vector<8x128xf32>,
    %c0_1 = arith.constant 0 : index
    %c0_2 = arith.constant 0 : index
    %2 = vector.load %arg0[%c0_1, %c0_2] : memref<2x36xf32, #tpu.memory_space<vmem>>, vector<2x36xf32>
    %c0_3 = arith.constant 0 : index
    %c0_4 = arith.constant 0 : index
    %3 = vector.load %arg5[%c0_3, %c0_4] : memref<8x128xf32, #tpu.memory_space<vmem>>, vector<2x36xf32>
    tpu.vector_store %arg5[%c0_3, %c0_4], %2 {strides = array<i32>} : memref<8x128xf32, #tpu.memory_space<vmem>>, vector<2x36xf32>,
    %c0_5 = arith.constant 0 : index
    %c0_6 = arith.constant 0 : index
    %4 = vector.load %arg1[%c0_5, %c0_6] : memref<2x36xf32, #tpu.memory_space<vmem>>, vector<2x36xf32>
    %c2 = arith.constant 2 : index
    %c0_7 = arith.constant 0 : index
    %5 = vector.load %arg5[%c2, %c0_7] : memref<8x128xf32, #tpu.memory_space<vmem>>, vector<2x36xf32>
    tpu.vector_store %arg5[%c2, %c0_7], %4 {strides = array<i32>} : memref<8x128xf32, #tpu.memory_space<vmem>>, vector<2x36xf32>,
    %c0_8 = arith.constant 0 : index
    %c0_9 = arith.constant 0 : index
    %6 = vector.load %arg2[%c0_8, %c0_9] : memref<2x36xf32, #tpu.memory_space<vmem>>, vector<2x36xf32>
    %c4 = arith.constant 4 : index
    %c0_10 = arith.constant 0 : index
    %7 = vector.load %arg5[%c4, %c0_10] : memref<8x128xf32, #tpu.memory_space<vmem>>, vector<2x36xf32>
    tpu.vector_store %arg5[%c4, %c0_10], %6 {strides = array<i32>} : memref<8x128xf32, #tpu.memory_space<vmem>>, vector<2x36xf32>,
    %cst_11 = arith.constant 1.000000e+00 : f32
    %8 = vector.broadcast %cst_11 : f32 to vector<8x1xf32>
    %c0_12 = arith.constant 0 : index
    %c36 = arith.constant 36 : index
    %9 = vector.load %arg5[%c0_12, %c36] : memref<8x128xf32, #tpu.memory_space<vmem>>, vector<8x1xf32>
    tpu.vector_store %arg5[%c0_12, %c36], %8 {strides = array<i32>} : memref<8x128xf32, #tpu.memory_space<vmem>>, vector<8x1xf32>,
    %c0_13 = arith.constant 0 : index
    %c0_14 = arith.constant 0 : index
    %10 = vector.load %arg5[%c0_13, %c0_14] : memref<8x128xf32, #tpu.memory_space<vmem>>, vector<8x128xf32>
    %11 = arith.truncf %10 : vector<8x128xf32> to vector<8x128xbf16>
    %c0_15 = arith.constant 0 : index
    %c0_16 = arith.constant 0 : index
    %c0_17 = arith.constant 0 : index
    %12 = vector.load %arg3[%c0_15, %c0_16, %c0_17] : memref<3x128x128xbf16, #tpu.memory_space<vmem>>, vector<1x128x128xbf16>
    %13 = vector.shape_cast %12 : vector<1x128x128xbf16> to vector<128x128xbf16>
    %cst_18 = arith.constant dense<0.000000e+00> : vector<8x128xf32>
    %14 = tpu.matmul %11, %13, %cst_18 {dimension_numbers = #tpu.dot_dimension_numbers<[1], [0], [0], [1], [0, 0, 1, 1], [], []>} : vector<8x128xbf16>, vector<128x128xbf16>, vector<8x128xf32> -> vector<8x128xf32>
    %cst_19 = arith.constant 0.000000e+00 : f32
    %15 = vector.broadcast %cst_19 : f32 to vector<8x128xf32>
    %16 = arith.maximumf %14, %15 : vector<8x128xf32>
    %17 = arith.truncf %16 : vector<8x128xf32> to vector<8x128xbf16>
    %c1 = arith.constant 1 : index
    %c0_20 = arith.constant 0 : index
    %c0_21 = arith.constant 0 : index
    %18 = vector.load %arg3[%c1, %c0_20, %c0_21] : memref<3x128x128xbf16, #tpu.memory_space<vmem>>, vector<1x128x128xbf16>
    %19 = vector.shape_cast %18 : vector<1x128x128xbf16> to vector<128x128xbf16>
    %cst_22 = arith.constant dense<0.000000e+00> : vector<8x128xf32>
    %20 = tpu.matmul %17, %19, %cst_22 {dimension_numbers = #tpu.dot_dimension_numbers<[1], [0], [0], [1], [0, 0, 1, 1], [], []>} : vector<8x128xbf16>, vector<128x128xbf16>, vector<8x128xf32> -> vector<8x128xf32>
    %cst_23 = arith.constant 0.000000e+00 : f32
    %21 = vector.broadcast %cst_23 : f32 to vector<8x128xf32>
    %22 = arith.maximumf %20, %21 : vector<8x128xf32>
    %23 = arith.truncf %22 : vector<8x128xf32> to vector<8x128xbf16>
    %c2_24 = arith.constant 2 : index
    %c0_25 = arith.constant 0 : index
    %c0_26 = arith.constant 0 : index
    %24 = vector.load %arg3[%c2_24, %c0_25, %c0_26] : memref<3x128x128xbf16, #tpu.memory_space<vmem>>, vector<1x128x128xbf16>
    %25 = vector.shape_cast %24 : vector<1x128x128xbf16> to vector<128x128xbf16>
    %cst_27 = arith.constant dense<0.000000e+00> : vector<8x128xf32>
    %26 = tpu.matmul %23, %25, %cst_27 {dimension_numbers = #tpu.dot_dimension_numbers<[1], [0], [0], [1], [0, 0, 1, 1], [], []>} : vector<8x128xbf16>, vector<128x128xbf16>, vector<8x128xf32> -> vector<8x128xf32>
    %c0_28 = arith.constant 0 : index
    %c0_29 = arith.constant 0 : index
    %27 = vector.load %arg4[%c0_28, %c0_29] : memref<8x128xf32, #tpu.memory_space<vmem>>, vector<8x128xf32>
    tpu.vector_store %arg4[%c0_28, %c0_29], %26 {strides = array<i32>} : memref<8x128xf32, #tpu.memory_space<vmem>>, vector<8x128xf32>,
    return
  }
}

</mosaic_0001>

<bundles_post_ra>
// kernel: squeeze.3
= control target key start
LH: loop header
LB: loop body
LE: loop exit
PB: predicated region body
PF: predicated region fallthrough
CT: control target
= control target key end

     0   :  { %s135_s0 = inlined_call_operand.vmem [shape: f32[2,128], index: 0, kind: input, shape index: {}]   ;;  %s136_s1 = inlined_call_operand.hbm [shape: f32[2,8,16], index: 1, kind: output, shape index: {}]  }
   0x1   :  { %v5_v0 = vld [vmem:[%s135_s0] sm:$0x3] }
   0x2   :  { %6 = vst [vmem:[#allocation2] sm:$0x3] %v5_v0 }
   0x3   :  { %2 = vsyncpa [#allocation1], 0  ;;  %s94_s0 = smov 112   ;;  %s95_s8 = smov 80   ;;  %vm8_vm0 = vcmask 130048  }
   0x4   :  { %s96_s9 = smov 96   ;;  %s97_s10 = smov 64  }
   0x5   :  { %s98_s11 = smov 48   ;;  %s99_s12 = smov 32  }
   0x6   :  { %s100_s13 = smov 16   ;;  %s101_s14 = smov [#allocation0]  }
   0x7   :  { %s56_s15 = sshll.u32 %s101_s14, 4  ;;  %s57_s15 = int_to_ptr.vmem [resolvable:$true] %s56_s15 }
   0x8   :  { %s70_s16 = scalar_lea.vmem %s57_s15, 256  ;;  %p75_p1 = scmp.lt.s32.totalorder %s57_s15, %s57_s15 }
   0x9   :  { %v10_v1 = vld [vmem:[#allocation2] sm:$0x3]   ;;  %p71_p0 = scmp.ne.s32.totalorder %s57_s15, %s70_s16  ;;  %p76_p2 = scmp.lt.s32.totalorder %s70_s16, %s70_s16 }
   0xa   :  { %v22_v2 = vld [vmem:[#allocation2] sm:$0x3]   ;;  %11 = vrot.lane.b32.xlu0 %v10_v1, %s94_s0 }
   0xb   :  { %23 = vrot.lane.b32.xlu1 %v22_v2, %s95_s8  ;;  %v16_v3 = vld [vmem:[#allocation2] sm:$0x3]   ;;  %p77_p3 = por %p76_p2, %p75_p1 }
   0xc   :  { %v28_v4 = vld [vmem:[#allocation2] sm:$0x3]  }
   0xd   :  { %v7_v5 = vld [vmem:[#allocation2] sm:$0x3]   ;;  %p78_p4 = pnand %p77_p3, %p71_p0 }
   0xe   :  { %9 = vst.msk [vmem:[#allocation0] ss:$8 sm:$0x3] %vm8_vm0, %v7_v5   ;;  %17 = vrot.lane.b32.xlu0 %v16_v3, %s96_s9  ;;  %v34_v6 = vld [vmem:[#allocation2] sm:$0x3]  }
   0xf   :  { %29 = vrot.lane.b32.xlu1 %v28_v4, %s97_s10  ;;  %v40_v7 = vld [vmem:[#allocation2] sm:$0x3]  }
  0x10   :  { %v46_v8 = vld [vmem:[#allocation2] sm:$0x3]  }
  0x12   :  { %35 = vrot.lane.b32.xlu0 %v34_v6, %s98_s11 }
  0x13   :  { %41 = vrot.lane.b32.xlu1 %v40_v7, %s99_s12 }
  0x16   :  { %47 = vrot.lane.b32.xlu0 %v46_v8, %s100_s13 }
  0x7c   :  { %v12_v9 = vpop.permute.xlu0 %11  }
  0x7d   :  { %v24_v10 = vpop.permute.xlu1 %23   ;;  %15 = vst.msk [vmem:[#allocation0 + $0x1] ss:$8 sm:$0x3] %vm8_vm0, %v12_v9  }
  0x7e   :  { %27 = vst.msk [vmem:[#allocation0 + $0x3] ss:$8 sm:$0x3] %vm8_vm0, %v24_v10  }
  0x80   :  { %v18_v11 = vpop.permute.xlu0 %17  }
  0x81   :  { %v30_v12 = vpop.permute.xlu1 %29   ;;  %21 = vst.msk [vmem:[#allocation0 + $0x2] ss:$8 sm:$0x3] %vm8_vm0, %v18_v11  }
  0x82   :  { %33 = vst.msk [vmem:[#allocation0 + $0x4] ss:$8 sm:$0x3] %vm8_vm0, %v30_v12  }
  0x84   :  { %v36_v13 = vpop.permute.xlu0 %35  }
  0x85   :  { %v42_v14 = vpop.permute.xlu1 %41   ;;  %39 = vst.msk [vmem:[#allocation0 + $0x5] ss:$8 sm:$0x3] %vm8_vm0, %v36_v13  }
  0x86   :  { %45 = vst.msk [vmem:[#allocation0 + $0x6] ss:$8 sm:$0x3] %vm8_vm0, %v42_v14  }
  0x88   :  { %v48_v15 = vpop.permute.xlu0 %47  }
  0x89   :  { %51 = vst.msk [vmem:[#allocation0 + $0x7] ss:$8 sm:$0x3] %vm8_vm0, %v48_v15  }
  0x8a   :  { %81 = shalt.err (!%p78_p4)
}
  0x8b   :  { %s82_s19 = scalar_lea.hbm %s136_s1, 256 }
  0x8c   :  { %p83_p5 = scmp.ne.s32.totalorder %s136_s1, %s82_s19  ;;  %p86_p6 = scmp.lt.u32.totalorder %s82_s19, %s136_s1 }
  0x8e   :  { %p88_p7 = pnand %p86_p6, %p83_p5 }
  0x90   :  { %91 = shalt.err (!%p88_p7)
}
  0x91   :  { %59 = dma.vmem_to_hbm [thread:$0]  %s57_s15, 256, %s136_s1, [#allocation1]  }
  0x92   :  { %92 = dma.done.wait [#allocation1], 256  }
  0x93   :  { %93 = vsyncadd [#allocation1], 4294967040 }
  0x94   :  { %61 = vsyncpa [#allocation1], 1 }

// kernel: triplet_forward_fn.1
= control target key start
LH: loop header
LB: loop body
LE: loop exit
PB: predicated region body
PF: predicated region fallthrough
CT: control target
= control target key end

     0   :  { %9 = vsyncpa [#allocation4], 0  ;;  %s533_s15 = smov [#allocation3]   ;;  %s619_s0 = inlined_call_operand.vmem [shape: f32[2,36], index: 0, kind: input, shape index: {}]   ;;  %s620_s1 = inlined_call_operand.vmem [shape: f32[2,36], index: 1, kind: input, shape index: {}]   ;;  %s621_s2 = inlined_call_operand.vmem [shape: f32[2,36], index: 2, kind: input, shape index: {}]   ;;  %s622_s3 = inlined_call_operand.hbm [shape: bf16[3,128,128], index: 3, kind: input, shape index: {}]   ;;  %s623_s4 = inlined_call_operand.vmem [shape: f32[8,128], index: 4, kind: output, shape index: {}]  }
   0x1   :  { %s21_s16 = sshll.u32 %s533_s15, 4  ;;  %s509_s19 = scalar_lea.hbm %s622_s3, 3072  ;;  %s22_s16 = int_to_ptr.vmem [resolvable:$true] %s21_s16 }
   0x2   :  { %p510_p0 = scmp.ne.s32.totalorder %s622_s3, %s509_s19  ;;  %p513_p1 = scmp.lt.u32.totalorder %s509_s19, %s622_s3 }
   0x4   :  { %p515_p2 = pnand %p513_p1, %p510_p0 }
   0x6   :  { %518 = shalt.err (!%p515_p2)
}
   0x7   :  { %s519_s24 = scalar_lea.vmem %s22_s16, 3072  ;;  %p524_p4 = scmp.lt.s32.totalorder %s22_s16, %s22_s16 }
   0x8   :  { %p520_p3 = scmp.ne.s32.totalorder %s22_s16, %s519_s24  ;;  %p525_p5 = scmp.lt.s32.totalorder %s519_s24, %s519_s24 }
   0xa   :  { %p526_p6 = por %p525_p5, %p524_p4 }
   0xc   :  { %p527_p7 = pnand %p526_p6, %p520_p3 }
   0xe   :  { %530 = shalt.err (!%p527_p7)
}
   0xf   :  { %s534_s25 = smov 64   ;;  %s535_s26 = smov 4  }
  0x10   :  { %27 = dma.hbm_to_vmem [thread:$0]  %s622_s3, 3072, %s22_s16, [#allocation4], %s534_s25, %s534_s25, %s535_s26  }
  0x11   :  { %531 = dma.done.wait [#allocation4], 3072  }
  0x12   :  { %532 = vsyncadd [#allocation4], 4294964224  ;;  %v536_v0 = vmov 0.0   ;;  %vm537_vm0 = vmmov 0   ;;  %v485_v1 = vld [vmem:[#allocation3] sm:$0xff]   ;;  %v486_v2 = vld [vmem:[#allocation3 + $0x8] sm:$0xff]  }
  0x13   :  { %419 = vmatprep.subr.bf16.mxu0 %v536_v0  ;;  %32 = vst [vmem:[#allocation2] sm:$0xff] %v536_v0  ;;  %435 = vmatprep.mubr.msk.bf16.mxu0 %vm537_vm0, %v536_v0  ;;  %v487_v3 = vld [vmem:[#allocation3 + $0x10] sm:$0xff]   ;;  %vm34_vm1 = vcmask 287744   ;;  %vm40_vm2 = vcmask 302368   ;;  %v33_v4 = vld [vmem:[%s619_s0] sm:$0x3] }
  0x14   :  { %439 = vmatprep.subr.bf16.mxu1 %v536_v0  ;;  %455 = vmatprep.mubr.msk.bf16.mxu1 %vm537_vm0, %v536_v0  ;;  %v36_v5 = vld [vmem:[%s620_s1] sm:$0x3]  ;;  %35 = vst.msk [vmem:[#allocation2] sm:$0x3] %vm34_vm1, %v33_v4  ;;  %v493_v7 = vld [vmem:[#allocation3 + $0x40] sm:$0xff]   ;;  %v538_v9 = vmov 1.0  }
  0x15   :  { %420 = vmatpush3.bf16.msra.mxu0 %v485_v1  ;;  %v38_v6 = vld [vmem:[%s621_s2] sm:$0x3]  ;;  %37 = vst.msk [vmem:[#allocation2 + $0x2] sm:$0x3] %vm34_vm1, %v36_v5  ;;  %440 = vmatpush3.bf16.msra.mxu1 %v493_v7  ;;  %v494_v10 = vld [vmem:[#allocation3 + $0x48] sm:$0xff]   ;;  %v489_v11 = vld [vmem:[#allocation3 + $0x20] sm:$0xff]  }
  0x16   :  { %421 = vmatprep.subr.bf16.mxu0 %v536_v0  ;;  %39 = vst.msk [vmem:[#allocation2 + $0x4] sm:$0x3] %vm34_vm1, %v38_v6  ;;  %v488_v8 = vld [vmem:[#allocation3 + $0x18] sm:$0xff]   ;;  %441 = vmatprep.subr.bf16.mxu1 %v536_v0  ;;  %v495_v12 = vld [vmem:[#allocation3 + $0x50] sm:$0xff]   ;;  %v490_v13 = vld [vmem:[#allocation3 + $0x28] sm:$0xff]  }
  0x17   :  { %41 = vst.msk [vmem:[#allocation2] sm:$0xff] %vm40_vm2, %v538_v9  ;;  %v496_v14 = vld [vmem:[#allocation3 + $0x58] sm:$0xff]   ;;  %v491_v15 = vld [vmem:[#allocation3 + $0x30] sm:$0xff]   ;;  %v497_v16 = vld [vmem:[#allocation3 + $0x60] sm:$0xff]  }
  0x18   :  { %v492_v17 = vld [vmem:[#allocation3 + $0x38] sm:$0xff]   ;;  %v498_v19 = vld [vmem:[#allocation3 + $0x68] sm:$0xff]   ;;  %v499_v21 = vld [vmem:[#allocation3 + $0x70] sm:$0xff]  }
  0x19   :  { %422 = vmatpush3.bf16.msra.mxu0 %v486_v2  ;;  %442 = vmatpush3.bf16.msra.mxu1 %v494_v10  ;;  %v500_v22 = vld [vmem:[#allocation3 + $0x78] sm:$0xff]   ;;  %v501_v23 = vld [vmem:[#allocation3 + $0x80] sm:$0xff]   ;;  %v502_v24 = vld [vmem:[#allocation3 + $0x88] sm:$0xff]  }
  0x1a   :  { %423 = vmatprep.subr.bf16.mxu0 %v536_v0  ;;  %443 = vmatprep.subr.bf16.mxu1 %v536_v0  ;;  %v503_v25 = vld [vmem:[#allocation3 + $0x90] sm:$0xff]   ;;  %v504_v26 = vld [vmem:[#allocation3 + $0x98] sm:$0xff]   ;;  %v505_v27 = vld [vmem:[#allocation3 + $0xa0] sm:$0xff]  }
  0x1b   :  { %v506_v28 = vld [vmem:[#allocation3 + $0xa8] sm:$0xff]   ;;  %v507_v29 = vld [vmem:[#allocation3 + $0xb0] sm:$0xff]   ;;  %v508_v36 = vld [vmem:[#allocation3 + $0xb8] sm:$0xff]  }
  0x1d   :  { %424 = vmatpush3.bf16.msra.mxu0 %v487_v3  ;;  %444 = vmatpush3.bf16.msra.mxu1 %v495_v12 }
  0x1e   :  { %425 = vmatprep.subr.bf16.mxu0 %v536_v0  ;;  %445 = vmatprep.subr.bf16.mxu1 %v536_v0  ;;  %v42_v18 = vld [vmem:[#allocation2] sm:$0xff] }
  0x1f   :  { %v43_v20 = vpack.c.bf16 %v42_v18, %v42_v18 }
  0x21   :  { %426 = vmatpush3.bf16.msra.mxu0 %v488_v8  ;;  %446 = vmatpush3.bf16.msra.mxu1 %v496_v14 }
  0x22   :  { %427 = vmatprep.subr.bf16.mxu0 %v536_v0  ;;  %447 = vmatprep.subr.bf16.mxu1 %v536_v0 }
  0x25   :  { %428 = vmatpush3.bf16.msra.mxu0 %v489_v11  ;;  %448 = vmatpush3.bf16.msra.mxu1 %v497_v16 }
  0x26   :  { %429 = vmatprep.subr.bf16.mxu0 %v536_v0  ;;  %449 = vmatprep.subr.bf16.mxu1 %v536_v0 }
  0x29   :  { %430 = vmatpush3.bf16.msra.mxu0 %v490_v13  ;;  %450 = vmatpush3.bf16.msra.mxu1 %v498_v19 }
  0x2a   :  { %431 = vmatprep.subr.bf16.mxu0 %v536_v0  ;;  %451 = vmatprep.subr.bf16.mxu1 %v536_v0 }
  0x2d   :  { %432 = vmatpush3.bf16.msra.mxu0 %v491_v15  ;;  %452 = vmatpush3.bf16.msra.mxu1 %v499_v21 }
  0x2e   :  { %433 = vmatprep.subr.bf16.mxu0 %v536_v0  ;;  %453 = vmatprep.subr.bf16.mxu1 %v536_v0 }
  0x31   :  { %434 = vmatpush3.bf16.msra.mxu0 %v492_v17  ;;  %454 = vmatpush3.bf16.msra.mxu1 %v500_v22 }
  0x32   :  { %459 = vmatprep.subr.bf16.mxu0 %v536_v0 }
  0x34   :  { %436 = vmatmul.mubr.bf16.vlgmr.msra.gmra.mrb[0].mxu0 %v43_v20 }
  0x35   :  { %475 = vmatprep.mubr.msk.bf16.mxu0 %vm537_vm0, %v536_v0  ;;  %460 = vmatpush3.bf16.msra.mxu0 %v501_v23 }
  0x36   :  { %461 = vmatprep.subr.bf16.mxu0 %v536_v0 }
  0x39   :  { %462 = vmatpush3.bf16.msra.mxu0 %v502_v24 }
  0x3a   :  { %463 = vmatprep.subr.bf16.mxu0 %v536_v0 }
  0x3d   :  { %464 = vmatpush3.bf16.msra.mxu0 %v503_v25 }
  0x3e   :  { %465 = vmatprep.subr.bf16.mxu0 %v536_v0 }
  0x41   :  { %466 = vmatpush3.bf16.msra.mxu0 %v504_v26 }
  0x42   :  { %467 = vmatprep.subr.bf16.mxu0 %v536_v0 }
  0x45   :  { %468 = vmatpush3.bf16.msra.mxu0 %v505_v27 }
  0x46   :  { %469 = vmatprep.subr.bf16.mxu0 %v536_v0 }
  0x49   :  { %470 = vmatpush3.bf16.msra.mxu0 %v506_v28 }
  0x4a   :  { %471 = vmatprep.subr.bf16.mxu0 %v536_v0 }
  0x4d   :  { %472 = vmatpush3.bf16.msra.mxu0 %v507_v29 }
  0x4e   :  { %473 = vmatprep.subr.bf16.mxu0 %v536_v0 }
  0x51   :  { %474 = vmatpush3.bf16.msra.mxu0 %v508_v36 }
 0x107   :  { %v142_v30 = vpop.f32.mrb[0].mxu0 }
 0x108   :  { %v148_v31 = vmax.f32 %v142_v30, 0.0  ;;  %v437_v32 = vpop.f32.mrb[1].mxu0 }
 0x109   :  { %v145_v33 = vpop.f32.mrb[2].mxu0 }
 0x10a   :  { %v149_v34 = vpack.c.bf16 %v148_v31, %v148_v31  ;;  %v438_v35 = vpop.f32.mrb[3].mxu0 }
 0x10c   :  { %456 = vmatmul.mubr.bf16.vlgmr.msra.gmra.mrb[0].mxu1 %v149_v34 }
 0x1df   :  { %v249_v37 = vpop.f32.mrb[0].mxu1 }
 0x1e0   :  { %v255_v38 = vmax.f32 %v249_v37, 0.0  ;;  %v457_v39 = vpop.f32.mrb[1].mxu1 }
 0x1e1   :  { %v252_v40 = vpop.f32.mrb[2].mxu1 }
 0x1e2   :  { %v256_v41 = vpack.c.bf16 %v255_v38, %v255_v38  ;;  %v458_v42 = vpop.f32.mrb[3].mxu1 }
 0x1e4   :  { %476 = vmatmul.mubr.bf16.vlgmr.msra.gmra.mrb[4].mxu0 %v256_v41 }
 0x2b7   :  { %v356_v43 = vpop.f32.mrb[4].mxu0 }
 0x2b8   :  { %362 = vst [vmem:[%s623_s4] sm:$0xff] %v356_v43  ;;  %v477_v44 = vpop.f32.mrb[5].mxu0 }
 0x2b9   :  { %v359_v45 = vpop.f32.mrb[6].mxu0 }
 0x2ba   :  { %v478_v46 = vpop.f32.mrb[7].mxu0 }
 0x2bb   :  { %367 = vsyncpa [#allocation4], 1 }

</bundles_post_ra>
